<compile_context>
chip_gen: v5e
topology: v5e:2x2
jax: 0.10.0
libtpu: 0.0.40
codegen_flags: <defaults>
</compile_context>

<pallas_src>
import jax
import jax.numpy as jnp
from jax.experimental import pallas as pl
from jax.experimental.pallas import tpu as pltpu


def _luong_attention_kernel(enc_ref, hid_ref, ctx_ref, attn_ref):
    # enc_ref block: (Bt, S, H) ; hid_ref block: (Bt, H)
    hid = hid_ref[...].astype(jnp.float32)                           # (Bt, H)

    # scores[b, s] = sum_h enc[b, s, h] * hid[b, h]
    # VPU multiply + lane reduce; f32 upcast folded into the consumer so the
    # f32 copy of the encoder tile is not kept live across both uses.
    scores = jnp.sum(enc_ref[...].astype(jnp.float32) * hid[:, None, :],
                     axis=-1)                                        # (Bt, S)

    # softmax over S (last / lane axis); exact normalization (weights sum to 1)
    m = jnp.max(scores, axis=-1, keepdims=True)                      # (Bt, 1)
    e = jnp.exp(scores - m)                                          # (Bt, S)
    w = e / jnp.sum(e, axis=-1, keepdims=True)                       # (Bt, S)

    # context[b, h] = sum_s w[b, s] * enc[b, s, h]   (VPU mul + sublane reduce)
    ctx = jnp.sum(w[:, :, None] * enc_ref[...].astype(jnp.float32),
                  axis=1)                                            # (Bt, H)

    ctx_ref[...] = ctx.astype(ctx_ref.dtype)
    attn_ref[...] = w.astype(attn_ref.dtype)


def _sublane_pack(itemsize):
    # Sublane pack of the I/O dtype: 8 (f32), 16 (bf16), 32 (int8/fp8).
    return max(8, 32 // max(int(itemsize), 1))


def _choose_block_b(B, S, H, itemsize, vmem_limit_bytes):
    """Pick batch rows per grid step."""
    pack = _sublane_pack(itemsize)

    # Live VMEM per batch row per pipeline step:
    #   2x double-buffered encoder DMA tile (input dtype)
    # + ~2x f32 in-kernel temporaries (upcast / elementwise product)
    # + double-buffered hid/ctx/attn tiles and their f32 temps.
    per_row = S * H * (2 * itemsize + 2 * 4) + (S + 2 * H) * (2 * itemsize + 4)
    budget = int(0.70 * vmem_limit_bytes)        # headroom for compiler scratch
    bt = max(pack, (budget // per_row) // pack * pack)

    # Never collapse to a single grid step when B allows a multi-step grid
    # (keeps DMA/compute overlap and both v7x TensorCores busy).
    if B >= 4 * pack:
        bt = min(bt, max(pack, (B // 4) // pack * pack))
    elif B >= 2 * pack:
        bt = min(bt, max(pack, (B // 2) // pack * pack))
    bt = min(bt, B)

    # Prefer an even number of main-grid steps (v7x: 2 TensorCores per chip).
    n = max(1, B // bt)
    if n > 1 and n % 2 == 1:
        bt_alt = max(pack, (B // (n + 1)) // pack * pack)
        if bt_alt <= bt and (B // bt_alt) % 2 == 0:
            bt = bt_alt
    return bt


def _luong_call(enc, hid, bt, n_steps, out_dtype, vmem_limit_bytes):
    """One pallas_call covering n_steps blocks of bt batch rows (from row 0)."""
    _, S, H = enc.shape
    rows = n_steps * bt
    itemsize = jnp.dtype(out_dtype).itemsize

    cost = pl.CostEstimate(
        flops=4 * rows * S * H,                    # scores + context mul/add
        transcendentals=rows * S,                  # exp
        bytes_accessed=(rows * S * H + rows * (S + 2 * H)) * itemsize,
    )
    grid_spec = pltpu.PrefetchScalarGridSpec(
        num_scalar_prefetch=0,
        grid=(n_steps,),
        in_specs=[
            pl.BlockSpec((bt, S, H), lambda b: (b, 0, 0)),   # encoder_outputs
            pl.BlockSpec((bt, H), lambda b: (b, 0)),         # hidden as (B, H)
        ],
        out_specs=[
            pl.BlockSpec((bt, H), lambda b: (b, 0)),         # context
            pl.BlockSpec((bt, S), lambda b: (b, 0)),         # attn weights
        ],
    )
    return pl.pallas_call(
        _luong_attention_kernel,
        out_shape=(
            jax.ShapeDtypeStruct((rows, H), out_dtype),
            jax.ShapeDtypeStruct((rows, S), out_dtype),
        ),
        grid_spec=grid_spec,
        compiler_params=pltpu.CompilerParams(
            dimension_semantics=("parallel",),
            vmem_limit_bytes=vmem_limit_bytes,
        ),
        cost_estimate=cost,
    )(enc, hid)


def luong_attention(hidden, encoder_outputs, *, block_b=None,
                    vmem_limit_bytes=48 * 1024 * 1024):
    """hidden: (1, B, H), encoder_outputs: (B, S, H) -> (context (B,H), weights (B,S))."""
    B, S, H = encoder_outputs.shape
    assert hidden.shape == (1, B, H)
    out_dtype = encoder_outputs.dtype
    itemsize = jnp.dtype(out_dtype).itemsize

    # (1, B, H) -> (B, H): leading dim is 1, pure (free) reshape, no transpose.
    hid = jnp.reshape(hidden, (B, H))

    if block_b is None:
        bt = _choose_block_b(B, S, H, itemsize, vmem_limit_bytes)
    else:
        bt = int(block_b)
    bt = max(1, min(bt, B))

    n_full = B // bt
    rem = B - n_full * bt

    ctx_parts, w_parts = [], []
    if n_full > 0:
        ctx_m, w_m = _luong_call(encoder_outputs, hid, bt, n_full,
                                 out_dtype, vmem_limit_bytes)
        ctx_parts.append(ctx_m)
        w_parts.append(w_m)
    if rem > 0:
        # Ragged batch tail: one extra tiny call over just the last `rem` rows.
        # Avoids the full-tensor jnp.pad (an extra HBM read+write pass over
        # encoder_outputs); only rem*S*H bytes are touched here.
        start = n_full * bt
        ctx_t, w_t = _luong_call(encoder_outputs[start:], hid[start:],
                                 rem, 1, out_dtype, vmem_limit_bytes)
        ctx_parts.append(ctx_t)
        w_parts.append(w_t)

    if len(ctx_parts) == 1:
        return ctx_parts[0], w_parts[0]
    return (jnp.concatenate(ctx_parts, axis=0),
            jnp.concatenate(w_parts, axis=0))


def _reference(hidden, encoder_outputs):
    # Pure-JAX reference matching the PyTorch forward.
    hid = jnp.transpose(hidden, (1, 2, 0))                               # (B, H, 1)
    scores = jnp.einsum('bsh,bhk->bsk', encoder_outputs, hid,
                        precision=jax.lax.Precision.HIGHEST)[..., 0]     # (B, S)
    w = jax.nn.softmax(scores, axis=1)                                   # (B, S)
    ctx = jnp.einsum('bs,bsh->bh', w, encoder_outputs,
                     precision=jax.lax.Precision.HIGHEST)                # (B, H)
    return ctx, w


if __name__ == "__main__":
    key = jax.random.PRNGKey(0)
    k_hid, k_enc, k_hid2, k_enc2, k_hid3, k_enc3 = jax.random.split(key, 6)

    # --- main test: shapes implied by the module (B=2, S=8, H=32) ---
    B, S, H = 2, 8, 32
    hidden = jax.random.normal(k_hid, (1, B, H), dtype=jnp.float32)
    encoder_outputs = jax.random.normal(k_enc, (B, S, H), dtype=jnp.float32)
    # `self.attn = nn.Linear(H, H)` is never used in forward(); no params needed.

    context, attn_weights = luong_attention(hidden, encoder_outputs)
    jax.block_until_ready((context, attn_weights))
    ref_ctx, ref_w = _reference(hidden, encoder_outputs)
    assert context.shape == (B, H) and attn_weights.shape == (B, S)
    assert jnp.allclose(context, ref_ctx, atol=1e-4, rtol=1e-4)
    assert jnp.allclose(attn_weights, ref_w, atol=1e-4, rtol=1e-4)

    # --- secondary test: multi-step grid + ragged batch tail (no jnp.pad) ---
    B2, S2, H2 = 20, 128, 256
    hidden2 = jax.random.normal(k_hid2, (1, B2, H2), dtype=jnp.float32)
    enc2 = jax.random.normal(k_enc2, (B2, S2, H2), dtype=jnp.float32)
    ctx2, w2 = luong_attention(hidden2, enc2, block_b=8)  # main grid=(2,) + 4-row tail call
    jax.block_until_ready((ctx2, w2))
    ref_ctx2, ref_w2 = _reference(hidden2, enc2)
    assert jnp.allclose(ctx2, ref_ctx2, atol=1e-4, rtol=1e-4)
    assert jnp.allclose(w2, ref_w2, atol=1e-4, rtol=1e-4)

    # --- third test: default block chooser -> >=4-step even parallel grid ---
    B3, S3, H3 = 32, 64, 128
    hidden3 = jax.random.normal(k_hid3, (1, B3, H3), dtype=jnp.float32)
    enc3 = jax.random.normal(k_enc3, (B3, S3, H3), dtype=jnp.float32)
    ctx3, w3 = luong_attention(hidden3, enc3)             # Bt=8 -> grid=(4,), no tail
    jax.block_until_ready((ctx3, w3))
    ref_ctx3, ref_w3 = _reference(hidden3, enc3)
    assert jnp.allclose(ctx3, ref_ctx3, atol=1e-4, rtol=1e-4)
    assert jnp.allclose(w3, ref_w3, atol=1e-4, rtol=1e-4)

    print("KERNEL_OK")
</pallas_src>

<mosaic_0001>
module attributes {stable_mosaic.version = 11 : i64} {
  func.func @_luong_attention_kernel(%arg0: i32, %arg1: memref<2x8x32xf32, #tpu.memory_space<vmem>>, %arg2: memref<2x32xf32, #tpu.memory_space<vmem>>, %arg3: memref<2x32xf32, #tpu.memory_space<vmem>>, %arg4: memref<2x8xf32, #tpu.memory_space<vmem>>) attributes {dimension_semantics = [#tpu.dimension_semantics<parallel>], iteration_bounds = array<i64: 1>, scalar_prefetch = 0 : i64, scratch_operands = 0 : i64, tpu.core_type = #tpu.core_type<tc>, window_params = [{transform_indices = @transform_0, window_bounds = array<i64: 2, 8, 32>}, {transform_indices = @transform_1, window_bounds = array<i64: 2, 32>}, {transform_indices = @transform_2, window_bounds = array<i64: 2, 32>}, {transform_indices = @transform_3, window_bounds = array<i64: 2, 8>}]} {
    %c0 = arith.constant 0 : index
    %c0_0 = arith.constant 0 : index
    %0 = vector.load %arg2[%c0, %c0_0] : memref<2x32xf32, #tpu.memory_space<vmem>>, vector<2x32xf32>
    %c0_1 = arith.constant 0 : index
    %c0_2 = arith.constant 0 : index
    %c0_3 = arith.constant 0 : index
    %1 = vector.load %arg1[%c0_1, %c0_2, %c0_3] : memref<2x8x32xf32, #tpu.memory_space<vmem>>, vector<2x8x32xf32>
    %2 = vector.shape_cast %0 : vector<2x32xf32> to vector<2x1x32xf32>
    %3 = vector.broadcast %2 : vector<2x1x32xf32> to vector<2x8x32xf32>
    %4 = arith.mulf %1, %3 : vector<2x8x32xf32>
    %cst = arith.constant dense<0.000000e+00> : vector<2x8xf32>
    %5 = vector.multi_reduction <add>, %4, %cst [2] : vector<2x8x32xf32> to vector<2x8xf32>
    %cst_4 = arith.constant dense<0xFF800000> : vector<2xf32>
    %6 = vector.multi_reduction <maximumf>, %5, %cst_4 [1] : vector<2x8xf32> to vector<2xf32>
    %7 = vector.shape_cast %6 : vector<2xf32> to vector<2x1xf32>
    %8 = vector.broadcast %7 : vector<2x1xf32> to vector<2x8xf32>
    %9 = arith.subf %5, %8 : vector<2x8xf32>
    %10 = math.exp %9 : vector<2x8xf32>
    %cst_5 = arith.constant dense<0.000000e+00> : vector<2xf32>
    %11 = vector.multi_reduction <add>, %10, %cst_5 [1] : vector<2x8xf32> to vector<2xf32>
    %12 = vector.shape_cast %11 : vector<2xf32> to vector<2x1xf32>
    %13 = vector.broadcast %12 : vector<2x1xf32> to vector<2x8xf32>
    %14 = arith.divf %10, %13 : vector<2x8xf32>
    %15 = vector.shape_cast %14 : vector<2x8xf32> to vector<2x8x1xf32>
    %c0_6 = arith.constant 0 : index
    %c0_7 = arith.constant 0 : index
    %c0_8 = arith.constant 0 : index
    %16 = vector.load %arg1[%c0_6, %c0_7, %c0_8] : memref<2x8x32xf32, #tpu.memory_space<vmem>>, vector<2x8x32xf32>
    %17 = vector.broadcast %15 : vector<2x8x1xf32> to vector<2x8x32xf32>
    %18 = arith.mulf %17, %16 : vector<2x8x32xf32>
    %cst_9 = arith.constant dense<0.000000e+00> : vector<2x32xf32>
    %19 = vector.multi_reduction <add>, %18, %cst_9 [1] : vector<2x8x32xf32> to vector<2x32xf32>
    %c0_10 = arith.constant 0 : index
    %c0_11 = arith.constant 0 : index
    %20 = vector.load %arg3[%c0_10, %c0_11] : memref<2x32xf32, #tpu.memory_space<vmem>>, vector<2x32xf32>
    tpu.vector_store %arg3[%c0_10, %c0_11], %19 {strides = array<i32>} : memref<2x32xf32, #tpu.memory_space<vmem>>, vector<2x32xf32>,
    %c0_12 = arith.constant 0 : index
    %c0_13 = arith.constant 0 : index
    %21 = vector.load %arg4[%c0_12, %c0_13] : memref<2x8xf32, #tpu.memory_space<vmem>>, vector<2x8xf32>
    tpu.vector_store %arg4[%c0_12, %c0_13], %14 {strides = array<i32>} : memref<2x8xf32, #tpu.memory_space<vmem>>, vector<2x8xf32>,
    return
  }
  func.func @transform_0(%arg0: i32) -> (i32, i32, i32) {
    %c0_i32 = arith.constant 0 : i32
    %c0_i32_0 = arith.constant 0 : i32
    %c0_i32_1 = arith.constant 0 : i32
    return %arg0, %c0_i32, %c0_i32_0 : i32, i32, i32
  }
  func.func @transform_1(%arg0: i32) -> (i32, i32) {
    %c0_i32 = arith.constant 0 : i32
    %c0_i32_0 = arith.constant 0 : i32
    return %arg0, %c0_i32 : i32, i32
  }
  func.func @transform_2(%arg0: i32) -> (i32, i32) {
    %c0_i32 = arith.constant 0 : i32
    %c0_i32_0 = arith.constant 0 : i32
    return %arg0, %c0_i32 : i32, i32
  }
  func.func @transform_3(%arg0: i32) -> (i32, i32) {
    %c0_i32 = arith.constant 0 : i32
    %c0_i32_0 = arith.constant 0 : i32
    return %arg0, %c0_i32 : i32, i32
  }
}

</mosaic_0001>

<bundles_post_ra>
// kernel: tpu_custom_call.1
= control target key start
LH: loop header
LB: loop body
LE: loop exit
PB: predicated region body
PF: predicated region fallthrough
CT: control target
= control target key end

     0   :  { %9 = vsyncpa [#allocation3], 0  ;;  %s396_s0 = inlined_call_operand.hbm [shape: f32[2,8,32], index: 0, kind: input, shape index: {}]   ;;  %s397_s1 = inlined_call_operand.hbm [shape: f32[2,32], index: 1, kind: input, shape index: {}]   ;;  %s398_s2 = inlined_call_operand.hbm [shape: f32[2,32], index: 2, kind: output, shape index: {0}]   ;;  %s399_s3 = inlined_call_operand.hbm [shape: f32[2,8], index: 3, kind: output, shape index: {1}]  }
   0x1   :  { %10 = vsyncpa [#allocation6], 0 }
   0x2   :  { %11 = vsyncpa [#allocation4], 0 }
   0x3   :  { %12 = vsyncpa [#allocation9], 0  ;;  %s17_s14 = sshll.u32 %s396_s0, 4  ;;  %s330_s15 = smov [#allocation2]   ;;  %s18_s14 = int_to_ptr.hbm [resolvable:$true] %s17_s14 }
   0x4   :  { %s19_s16 = sshll.u32 %s330_s15, 4  ;;  %s31_s19 = sshll.u32 %s397_s1, 4  ;;  %s20_s16 = int_to_ptr.vmem [resolvable:$true] %s19_s16  ;;  %s32_s19 = int_to_ptr.hbm [resolvable:$true] %s31_s19 }
   0x5   :  { %s331_s20 = smov 128   ;;  %s332_s21 = smov 8  }
   0x6   :  { %25 = dma.hbm_to_vmem [thread:$0]  %s18_s14, 256, %s20_s16, [#allocation3], %s331_s20, %s331_s20, %s332_s21  }
   0x7   :  { %s333_s22 = smov [#allocation5]  }
   0x8   :  { %s33_s23 = sshll.u32 %s333_s22, 4  ;;  %s34_s23 = int_to_ptr.vmem [resolvable:$true] %s33_s23 }
   0x9   :  { %36 = dma.hbm_to_vmem [thread:$0]  %s32_s19, 32, %s34_s23, [#allocation6]  }
   0xa   :  { %322 = dma.done.wait [#allocation3], 256  }
   0xb   :  { %323 = vsyncadd [#allocation3], 4294967040 }
   0xc   :  { %324 = dma.done.wait [#allocation6], 32  }
   0xd   :  { %325 = vsyncadd [#allocation6], 4294967264  ;;  %v45_v0 = vld [vmem:[#allocation5] sm:$0x3]  ;;  %v363_v1 = vld [vmem:[#allocation2] sm:$0xff]  ;;  %vm56_vm0 = vcmask 261120   ;;  %v65_v11 = vlaneseq }
   0xe   :  { %v50_v2 = vperm.slane %v45_v0, 0  ;;  %v49_v3 = vrot.slane %v45_v0, 1  ;;  %v366_v6 = vld [vmem:[#allocation2 + $0x8] sm:$0xff]  ;;  %vm69_vm1 = vcmask 1041409   ;;  %vm72_vm2 = vcmask 58368   ;;  %s335_s0 = smov [#allocation8]  }
   0xf   :  { %v371_v12 = vand.u32 127, %v65_v11  ;;  %v334_v18 = vmov 0   ;;  %s190_s1 = sshll.u32 %s335_s0, 4  ;;  %s192_s26 = sshll.u32 %s399_s3, 4  ;;  %vm167_vm11 = vcmask 254976   ;;  %s191_s1 = int_to_ptr.vmem [resolvable:$true] %s190_s1  ;;  %s193_s26 = int_to_ptr.hbm [resolvable:$true] %s192_s26 }
  0x10   :  { %v54_v4 = vmul.f32 %v50_v2, %v363_v1  ;;  %v51_v5 = vperm.slane %v49_v3, 0  ;;  %216 = vset.pattern.permute.xlu2 %v334_v18  ;;  %215 = vset.pattern.permute.xlu1 %v334_v18  ;;  %s336_s3 = smov [#allocation7]   ;;  %s181_s30 = sshll.u32 %s398_s2, 4  ;;  %s182_s30 = int_to_ptr.hbm [resolvable:$true] %s181_s30 }
  0x11   :  { %217 = vset.pattern.permute.xlu0 %v334_v18  ;;  %s179_s27 = sshll.u32 %s336_s3, 4  ;;  %s180_s27 = int_to_ptr.vmem [resolvable:$true] %s179_s27 }
  0x12   :  { %v57_v7 = vsel %vm56_vm0, %v54_v4, 0.0  ;;  %v55_v8 = vmul.f32 %v51_v5, %v366_v6 }
  0x13   :  { %58 = vadd.xlane.f32.xlu0 %v57_v7 }
  0x14   :  { %v60_v9 = vsel %vm56_vm0, %v55_v8, 0.0 }
  0x1b   :  { %61 = vadd.xlane.f32.xlu0 %v60_v9 }
  0x86   :  { %v59_v10 = vpop.xlane.xlu0 %58 }
  0x87   :  { %v67_v14 = vperm.slane %v59_v10, %v371_v12 }
  0x8e   :  { %v62_v13 = vpop.xlane.xlu0 %61 }
  0x8f   :  { %v68_v15 = vperm.slane %v62_v13, %v371_v12 }
  0x91   :  { %v70_v16 = vsel %vm69_vm1, %v68_v15, %v67_v14 }
  0x92   :  { %v73_v17 = vsel %vm72_vm2, %v70_v16, -inf }
  0x93   :  { %74 = vmax.xlane.f32.xlu1 %v73_v17 }
 0x106   :  { %v75_v19 = vpop.xlane.xlu1 %74 }
 0x107   :  { %v77_v20 = vperm.slane %v75_v19, 0  ;;  %v78_v21 = vperm.slane %v75_v19, 1 }
 0x109   :  { %v81_v22 = vsub.f32 %v59_v10, %v77_v20  ;;  %v82_v23 = vsub.f32 %v62_v13, %v78_v21 }
 0x10b   :  { %v83_v24 = vmul.f32 1.442695, %v81_v22  ;;  %v85_v25 = vmul.f32 1.442695, %v82_v23 }
 0x10d   :  { %218 = vpow2.f32 %v83_v24 }
 0x10e   :  { %220 = vpow2.f32 %v85_v25 }
 0x113   :  { %v219_v26 = vpop.eup %218 }
 0x114   :  { %v221_v27 = vpop.eup %220  ;;  %90 = vperm.xlu1 %215, %v219_v26  }
 0x115   :  { %93 = vperm.xlu2 %216, %v221_v27  }
 0x16f   :  { %v94_v28 = vpop.permute.xlu2 %93 }
 0x170   :  { %v96_v30 = vperm.slane %v94_v28, %v371_v12 }
 0x186   :  { %v91_v29 = vpop.permute.xlu1 %90 }
 0x187   :  { %v95_v31 = vperm.slane %v91_v29, %v371_v12 }
 0x189   :  { %v97_v32 = vsel %vm69_vm1, %v96_v30, %v95_v31 }
 0x18a   :  { %v99_v33 = vsel %vm72_vm2, %v97_v32, 0.0 }
 0x18b   :  { %100 = vadd.xlane.f32.xlu2 %v99_v33 }
 0x1fe   :  { %v101_v34 = vpop.xlane.xlu2 %100 }
 0x1ff   :  { %v103_v35 = vperm.slane %v101_v34, 0  ;;  %v104_v36 = vperm.slane %v101_v34, 1 }
 0x201   :  { %222 = vrcp.f32 %v103_v35  ;;  %v118_v43 = vand.u32 2147483648, %v103_v35  ;;  %v133_v44 = vand.u32 2147483648, %v104_v36  ;;  %v116_v46 = vand.u32 2147483647, %v103_v35 }
 0x202   :  { %224 = vrcp.f32 %v104_v36  ;;  %v131_v48 = vand.u32 2147483647, %v104_v36  ;;  %vm112_vm5 = vweird.f32 %v103_v35  ;;  %vm127_vm6 = vweird.f32 %v104_v36 }
 0x203   :  { %v119_v51 = vor.u32 1.1754944e-38, %v118_v43  ;;  %v134_v52 = vor.u32 1.1754944e-38, %v133_v44  ;;  %vm117_vm9 = vcmp.eq.f32.partialorder %v116_v46, 8.507059e+37 }
 0x204   :  { %vm132_vm10 = vcmp.eq.f32.partialorder %v131_v48, 8.507059e+37 }
 0x207   :  { %v223_v37 = vpop.eup %222 }
 0x208   :  { %v225_v38 = vpop.eup %224  ;;  %v108_v39 = vmul.f32 %v223_v37, %v103_v35  ;;  %vm113_vm3 = vweird.f32 %v223_v37 }
 0x209   :  { %v123_v40 = vmul.f32 %v225_v38, %v104_v36  ;;  %vm128_vm4 = vweird.f32 %v225_v38  ;;  %vm114_vm7 = vmor %vm112_vm5, %vm113_vm3 }
 0x20a   :  { %v109_v41 = vsub.f32 1.0, %v108_v39  ;;  %vm129_vm8 = vmor %vm127_vm6, %vm128_vm4 }
 0x20b   :  { %v124_v42 = vsub.f32 1.0, %v123_v40 }
 0x20c   :  { %v110_v45 = vmul.f32 %v223_v37, %v109_v41 }
 0x20d   :  { %v125_v47 = vmul.f32 %v225_v38, %v124_v42 }
 0x20e   :  { %v111_v49 = vadd.f32 %v223_v37, %v110_v45 }
 0x20f   :  { %v126_v50 = vadd.f32 %v225_v38, %v125_v47 }
 0x210   :  { %v115_v53 = vsel %vm114_vm7, %v223_v37, %v111_v49 }
 0x211   :  { %v130_v54 = vsel %vm129_vm8, %v225_v38, %v126_v50  ;;  %v120_v55 = vsel %vm117_vm9, %v119_v51, %v115_v53 }
 0x212   :  { %v135_v56 = vsel %vm132_vm10, %v134_v52, %v130_v54  ;;  %v121_v57 = vmul.f32 %v219_v26, %v120_v55 }
 0x213   :  { %v136_v58 = vmul.f32 %v221_v27, %v135_v56 }
 0x214   :  { %139 = vperm.xlu0 %217, %v121_v57  }
 0x215   :  { %144 = vperm.xlu1 %215, %v136_v58  }
 0x286   :  { %v140_v59 = vpop.permute.xlu0 %139 }
 0x287   :  { %v145_v60 = vpop.permute.xlu1 %144  ;;  %v147_v61 = vmul.f32 %v140_v59, %v363_v1  ;;  %v169_v62 = vperm.slane %v140_v59, %v371_v12 }
 0x288   :  { %v148_v63 = vmul.f32 %v145_v60, %v366_v6  ;;  %v170_v0 = vperm.slane %v145_v60, %v371_v12 }
 0x289   :  { %v149_v2 = vsel %vm56_vm0, %v147_v61, 0.0 }
 0x28a   :  { %v156_v3 = vsel %vm56_vm0, %v148_v63, 0.0  ;;  %v150_v4 = vrot.slane %v149_v2, 4  ;;  %v171_v5 = vsel %vm69_vm1, %v170_v0, %v169_v62 }
 0x28b   :  { %v157_v7 = vrot.slane %v156_v3, 4  ;;  %173 = vst.msk [vmem:[#allocation8] sm:$0x3] %vm72_vm2, %v171_v5 }
 0x28c   :  { %v151_v8 = vadd.f32 %v150_v4, %v149_v2  ;;  %195 = dma.vmem_to_hbm [thread:$0]  %s191_s1, 32, %s193_s26, [#allocation9]  }
 0x28d   :  { %v158_v1 = vadd.f32 %v157_v7, %v156_v3 }
 0x28e   :  { %v152_v9 = vrot.slane %v151_v8, 2 }
 0x28f   :  { %v159_v10 = vrot.slane %v158_v1, 2 }
 0x290   :  { %v153_v6 = vadd.f32 %v152_v9, %v151_v8 }
 0x291   :  { %v160_v11 = vadd.f32 %v159_v10, %v158_v1 }
 0x292   :  { %v154_v12 = vrot.slane %v153_v6, 1 }
 0x293   :  { %v161_v13 = vrot.slane %v160_v11, 1 }
 0x294   :  { %v155_v14 = vadd.f32 %v154_v12, %v153_v6 }
 0x295   :  { %v162_v15 = vadd.f32 %v161_v13, %v160_v11 }
 0x297   :  { %v165_v16 = vsel %vm69_vm1, %v162_v15, %v155_v14 }
 0x298   :  { %168 = vst.msk [vmem:[#allocation7] sm:$0x3] %vm167_vm11, %v165_v16 }
 0x299   :  { %184 = dma.vmem_to_hbm [thread:$0]  %s180_s27, 32, %s182_s30, [#allocation4]  }
 0x29a   :  { %326 = dma.done.wait [#allocation4], 32  }
 0x29b   :  { %327 = vsyncadd [#allocation4], 4294967264 }
 0x29c   :  { %328 = dma.done.wait [#allocation9], 32  }
 0x29d   :  { %329 = vsyncadd [#allocation9], 4294967264 }
 0x29e   :  { %204 = vsyncpa [#allocation3], 1 }
 0x29f   :  { %205 = vsyncpa [#allocation6], 1 }
 0x2a0   :  { %206 = vsyncpa [#allocation4], 1 }
 0x2a1   :  { %207 = vsyncpa [#allocation9], 1 }

</bundles_post_ra>
